<compile_context>
chip_gen: v6e
topology: v6e:2x2x1
jax: 0.10.0
libtpu: 0.0.40
codegen_flags: <defaults>
</compile_context>

<pallas_src>
import jax
import jax.numpy as jnp
from jax.experimental import pallas as pl
from jax.experimental.pallas import tpu as pltpu

_BN_EPS = 1e-5
_LANE = 128


def _round_up(x, m):
    return (x + m - 1) // m * m


def _vmem_capacity_bytes():
    """Physical VMEM per core (v5e/v6e: 128 MiB, v7x: 64 MiB); safe fallback."""
    try:
        info = pltpu.get_tpu_info()
        for attr in ("vmem_capacity_bytes", "vmem_size_bytes", "vmem_bytes"):
            v = getattr(info, attr, None)
            if v:
                return int(v)
    except Exception:
        pass
    return 64 * 1024 * 1024  # conservative: v7x physical VMEM


def _auto_tile_p(K_pad, Cout_pad, vmem_limit_bytes):
    """Largest row-tile such that dbl-buffered bf16 patches/conv tiles + weight fit."""
    budget = int(vmem_limit_bytes * 0.8)
    fixed = 2 * K_pad * Cout_pad * 2 + 4 * 4 * Cout_pad   # weight (worst-case 2 bufs) + stats
    per_row = 2 * (K_pad * 2) + 2 * (Cout_pad * 2)        # 2x patches row + 2x conv row (bf16)
    tile = (budget - fixed) // per_row
    return max(8, min(int(tile), 4096))


def _conv_stats_kernel(p_ref, w_ref, conv_ref, sum_ref, sumsq_ref):
    """Pass 1: conv tile via bf16 MXU matmul (f32 acc) + per-image channel stats."""
    @pl.when(pl.program_id(1) == 0)
    def _():
        sum_ref[...] = jnp.zeros_like(sum_ref)
        sumsq_ref[...] = jnp.zeros_like(sumsq_ref)

    conv = jnp.dot(p_ref[...], w_ref[...], preferred_element_type=jnp.float32)
    conv_ref[...] = conv.astype(conv_ref.dtype)            # bf16 intermediate
    sum_ref[...] += jnp.sum(conv, axis=0, keepdims=True)   # f32 accumulators
    sumsq_ref[...] += jnp.sum(conv * conv, axis=0, keepdims=True)


def _bn_relu_kernel(conv_ref, scale_ref, shift_ref, out_ref):
    """Pass 2: streaming fused affine (precomputed scale/shift) + ReLU."""
    y = conv_ref[...].astype(jnp.float32) * scale_ref[...] + shift_ref[...]
    out_ref[...] = jnp.maximum(y, 0.0).astype(out_ref.dtype)


def conv_bn_relu(x_nchw, conv_w, conv_b, bn_gamma, bn_beta, *, stride=1,
                 tile_p=None):
    """Forward pass of ConvBNRelu. x_nchw: (N, Cin, H, W) float32, NCHW in/out."""
    del conv_b  # cancelled exactly by training-mode BatchNorm mean subtraction
    N, Cin, H, W = x_nchw.shape
    Cout = conv_w.shape[0]
    Ho = (H + 2 - 3) // stride + 1
    Wo = (W + 2 - 3) // stride + 1
    P = Ho * Wo                     # output pixels per image
    M = N * P                       # total BN population per channel
    K = 9 * Cin

    K_pad = _round_up(K, 16)        # bf16 sublane multiple only (NOT 128 lanes)
    Cout_pad = _round_up(Cout, _LANE)   # lane-dense stores / full MXU width

    vmem_limit = int(min(_vmem_capacity_bytes() * 0.7, 100 * 1024 * 1024))
    if tile_p is None:
        tile_p = _auto_tile_p(K_pad, Cout_pad, vmem_limit)
    tile_p = int(max(8, min(tile_p, _round_up(P, 8))))
    tile_p = _round_up(tile_p, 8)
    P_pad = _round_up(P, tile_p)
    grid_p = P_pad // tile_p

    # ---- glue: im2col patch extraction (pure layout work, plain JAX) ----
    x_nhwc = jnp.transpose(x_nchw, (0, 2, 3, 1)).astype(jnp.float32)
    x_padded = jnp.pad(x_nhwc, ((0, 0), (1, 1), (1, 1), (0, 0)))
    taps = []
    for dy in range(3):
        for dx in range(3):
            taps.append(x_padded[:, dy:dy + (Ho - 1) * stride + 1:stride,
                                    dx:dx + (Wo - 1) * stride + 1:stride, :])
    patches = jnp.stack(taps, axis=3).reshape(N, P, K)
    # Zero padding: padded rows/cols give conv == 0 (no bias), so they do not
    # perturb the accumulated sum / sumsq.
    patches = jnp.pad(patches, ((0, 0), (0, P_pad - P), (0, K_pad - K)))
    patches = patches.astype(jnp.bfloat16)

    # torch weight (Cout, Cin, 3, 3) -> (3, 3, Cin, Cout) -> (9*Cin, Cout), padded.
    w_flat = jnp.transpose(conv_w, (2, 3, 1, 0)).reshape(K, Cout)
    w_flat = jnp.pad(w_flat.astype(jnp.float32),
                     ((0, K_pad - K), (0, Cout_pad - Cout))).astype(jnp.bfloat16)

    # ---- pass 1: tiled bf16 MXU matmul + per-image resident stats accumulators
    # Grid axis 0 (images) is "parallel" -> shards across both TensorCores on
    # v7x; axis 1 (row tiles) is the stats-accumulation axis ("arbitrary").
    # The weight BlockSpec has a constant index_map so it stays VMEM-resident.
    conv_flat, psum, psumsq = pl.pallas_call(
        _conv_stats_kernel,
        out_shape=(
            jax.ShapeDtypeStruct((N, P_pad, Cout_pad), jnp.bfloat16),
            jax.ShapeDtypeStruct((N, 1, Cout_pad), jnp.float32),
            jax.ShapeDtypeStruct((N, 1, Cout_pad), jnp.float32),
        ),
        grid=(N, grid_p),
        in_specs=[
            pl.BlockSpec((None, tile_p, K_pad), lambda n, i: (n, i, 0)),
            pl.BlockSpec((K_pad, Cout_pad), lambda n, i: (0, 0)),
        ],
        out_specs=(
            pl.BlockSpec((None, tile_p, Cout_pad), lambda n, i: (n, i, 0)),
            pl.BlockSpec((None, 1, Cout_pad), lambda n, i: (n, 0, 0)),
            pl.BlockSpec((None, 1, Cout_pad), lambda n, i: (n, 0, 0)),
        ),
        compiler_params=pltpu.CompilerParams(
            dimension_semantics=("parallel", "arbitrary"),
            vmem_limit_bytes=vmem_limit),
        cost_estimate=pl.CostEstimate(
            flops=2 * N * P_pad * K_pad * Cout_pad,
            transcendentals=0,
            bytes_accessed=2 * (N * P_pad * K_pad + K_pad * Cout_pad
                                + N * P_pad * Cout_pad) + 8 * N * Cout_pad),
    )(patches, w_flat)

    # ---- tiny wrapper math: reduce per-image stats, fold BN into scale/shift --
    ch_sum = jnp.sum(psum[:, 0, :], axis=0)                 # (Cout_pad,)
    ch_sumsq = jnp.sum(psumsq[:, 0, :], axis=0)
    inv_m = 1.0 / float(M)
    mean = ch_sum * inv_m
    var = ch_sumsq * inv_m - mean * mean                    # biased variance
    gamma_p = jnp.pad(bn_gamma.astype(jnp.float32), (0, Cout_pad - Cout))
    beta_p = jnp.pad(bn_beta.astype(jnp.float32), (0, Cout_pad - Cout))
    # Padded channels: gamma==0 -> scale==0, shift==0 (no NaN; sliced away below)
    scale = gamma_p * jax.lax.rsqrt(var + _BN_EPS)
    shift = beta_p - mean * scale
    scale2 = scale.reshape(1, Cout_pad)
    shift2 = shift.reshape(1, Cout_pad)

    # ---- pass 2: streaming fused BN affine + ReLU, fully parallel over tiles --
    out_flat = pl.pallas_call(
        _bn_relu_kernel,
        out_shape=jax.ShapeDtypeStruct((N, P_pad, Cout_pad), jnp.float32),
        grid=(N, grid_p),
        in_specs=[
            pl.BlockSpec((None, tile_p, Cout_pad), lambda n, i: (n, i, 0)),
            pl.BlockSpec((1, Cout_pad), lambda n, i: (0, 0)),
            pl.BlockSpec((1, Cout_pad), lambda n, i: (0, 0)),
        ],
        out_specs=pl.BlockSpec((None, tile_p, Cout_pad), lambda n, i: (n, i, 0)),
        compiler_params=pltpu.CompilerParams(
            dimension_semantics=("parallel", "parallel"),
            vmem_limit_bytes=vmem_limit),
    )(conv_flat, scale2, shift2)

    out = out_flat[:, :P, :Cout].reshape(N, Ho, Wo, Cout)
    return jnp.transpose(out, (0, 3, 1, 2))                 # back to NCHW


def _reference(x, w, b, gamma, beta, *, stride=1):
    conv = jax.lax.conv_general_dilated(
        x, w, window_strides=(stride, stride), padding=((1, 1), (1, 1)),
        dimension_numbers=("NCHW", "OIHW", "NCHW"))
    conv = conv + b.reshape(1, -1, 1, 1)
    mean = jnp.mean(conv, axis=(0, 2, 3), keepdims=True)
    var = jnp.mean((conv - mean) ** 2, axis=(0, 2, 3), keepdims=True)
    y = (conv - mean) / jnp.sqrt(var + _BN_EPS)
    y = y * gamma.reshape(1, -1, 1, 1) + beta.reshape(1, -1, 1, 1)
    return jnp.maximum(y, 0.0)


if __name__ == "__main__":
    # Small shapes consistent with the module: batch=2, channels_in=4,
    # channels_out=8, spatial=16, stride=1.
    N, Cin, Cout, H, W, stride = 2, 4, 8, 16, 16, 1

    key = jax.random.PRNGKey(0)
    kx, kw, kb, kg, kbeta = jax.random.split(key, 5)
    x = jax.random.normal(kx, (N, Cin, H, W), dtype=jnp.float32)
    conv_w = jax.random.normal(kw, (Cout, Cin, 3, 3), dtype=jnp.float32) * 0.1
    conv_b = jax.random.normal(kb, (Cout,), dtype=jnp.float32) * 0.1
    bn_gamma = jax.random.normal(kg, (Cout,), dtype=jnp.float32) * 0.5 + 1.0
    bn_beta = jax.random.normal(kbeta, (Cout,), dtype=jnp.float32) * 0.1

    # tile_p=128 -> P=256 gives a 2-step accumulation axis per image and a
    # (2, 2) grid, exercising both the pipelined stats path and the parallel
    # image axis (not just a single block).
    out = conv_bn_relu(x, conv_w, conv_b, bn_gamma, bn_beta,
                       stride=stride, tile_p=128)
    out = jax.block_until_ready(out)

    ref = _reference(x, conv_w, conv_b, bn_gamma, bn_beta, stride=stride)
    assert out.shape == (N, Cout, H // stride, W // stride)
    # bf16 MXU operands + bf16 conv intermediate vs an all-f32 reference.
    max_err = float(jnp.max(jnp.abs(out - ref)))
    assert jnp.allclose(out, ref, atol=5e-2, rtol=5e-2), (
        f"mismatch vs reference (max abs err {max_err})")

    print("KERNEL_OK")
</pallas_src>

<mosaic_0001>
module attributes {stable_mosaic.version = 11 : i64} {
  func.func @_conv_stats_kernel(%arg0: i32, %arg1: i32, %arg2: memref<1x128x48xbf16, #tpu.memory_space<vmem>>, %arg3: memref<48x128xbf16, #tpu.memory_space<vmem>>, %arg4: memref<1x128x128xbf16, #tpu.memory_space<vmem>>, %arg5: memref<1x1x128xf32, #tpu.memory_space<vmem>>, %arg6: memref<1x1x128xf32, #tpu.memory_space<vmem>>) attributes {dimension_semantics = [#tpu.dimension_semantics<parallel>, #tpu.dimension_semantics<arbitrary>], iteration_bounds = array<i64: 2, 2>, scalar_prefetch = 0 : i64, scratch_operands = 0 : i64, tpu.core_type = #tpu.core_type<tc>, window_params = [{transform_indices = @transform_0, window_bounds = array<i64: 1, 128, 48>}, {pipeline_mode = #tpu.pipeline_mode<synchronous>, transform_indices = @transform_1, window_bounds = array<i64: 48, 128>}, {transform_indices = @transform_2, window_bounds = array<i64: 1, 128, 128>}, {transform_indices = @transform_3, window_bounds = array<i64: 1, 1, 128>}, {transform_indices = @transform_4, window_bounds = array<i64: 1, 1, 128>}]} {
    %c0_i32 = arith.constant 0 : i32
    %0 = arith.cmpi eq, %arg1, %c0_i32 : i32
    %1 = arith.extui %0 : i1 to i32
    %c0_i32_0 = arith.constant 0 : i32
    %2 = arith.cmpi ne, %1, %c0_i32_0 : i32
    scf.if %2 {
      %cst_22 = arith.constant 0.000000e+00 : f32
      %28 = vector.broadcast %cst_22 : f32 to vector<1x128xf32>
      %c0_23 = arith.constant 0 : index
      %c0_24 = arith.constant 0 : index
      %c0_25 = arith.constant 0 : index
      %29 = vector.load %arg5[%c0_23, %c0_24, %c0_25] : memref<1x1x128xf32, #tpu.memory_space<vmem>>, vector<1x1x128xf32>
      %30 = vector.shape_cast %29 : vector<1x1x128xf32> to vector<1x128xf32>
      %31 = vector.shape_cast %28 : vector<1x128xf32> to vector<1x1x128xf32>
      tpu.vector_store %arg5[%c0_23, %c0_24, %c0_25], %31 {strides = array<i32>} : memref<1x1x128xf32, #tpu.memory_space<vmem>>, vector<1x1x128xf32>,
      %cst_26 = arith.constant 0.000000e+00 : f32
      %32 = vector.broadcast %cst_26 : f32 to vector<1x128xf32>
      %c0_27 = arith.constant 0 : index
      %c0_28 = arith.constant 0 : index
      %c0_29 = arith.constant 0 : index
      %33 = vector.load %arg6[%c0_27, %c0_28, %c0_29] : memref<1x1x128xf32, #tpu.memory_space<vmem>>, vector<1x1x128xf32>
      %34 = vector.shape_cast %33 : vector<1x1x128xf32> to vector<1x128xf32>
      %35 = vector.shape_cast %32 : vector<1x128xf32> to vector<1x1x128xf32>
      tpu.vector_store %arg6[%c0_27, %c0_28, %c0_29], %35 {strides = array<i32>} : memref<1x1x128xf32, #tpu.memory_space<vmem>>, vector<1x1x128xf32>,
    } else {
    }
    %c0 = arith.constant 0 : index
    %c0_1 = arith.constant 0 : index
    %c0_2 = arith.constant 0 : index
    %3 = vector.load %arg2[%c0, %c0_1, %c0_2] : memref<1x128x48xbf16, #tpu.memory_space<vmem>>, vector<1x128x48xbf16>
    %4 = vector.shape_cast %3 : vector<1x128x48xbf16> to vector<128x48xbf16>
    %c0_3 = arith.constant 0 : index
    %c0_4 = arith.constant 0 : index
    %5 = vector.load %arg3[%c0_3, %c0_4] : memref<48x128xbf16, #tpu.memory_space<vmem>>, vector<48x128xbf16>
    %cst = arith.constant dense<0.000000e+00> : vector<128x128xf32>
    %6 = tpu.matmul %4, %5, %cst {dimension_numbers = #tpu.dot_dimension_numbers<[1], [0], [0], [1], [0, 0, 1, 1], [], []>} : vector<128x48xbf16>, vector<48x128xbf16>, vector<128x128xf32> -> vector<128x128xf32>
    %7 = arith.truncf %6 : vector<128x128xf32> to vector<128x128xbf16>
    %c0_5 = arith.constant 0 : index
    %c0_6 = arith.constant 0 : index
    %c0_7 = arith.constant 0 : index
    %8 = vector.load %arg4[%c0_5, %c0_6, %c0_7] : memref<1x128x128xbf16, #tpu.memory_space<vmem>>, vector<1x128x128xbf16>
    %9 = vector.shape_cast %8 : vector<1x128x128xbf16> to vector<128x128xbf16>
    %10 = vector.shape_cast %7 : vector<128x128xbf16> to vector<1x128x128xbf16>
    tpu.vector_store %arg4[%c0_5, %c0_6, %c0_7], %10 {strides = array<i32>} : memref<1x128x128xbf16, #tpu.memory_space<vmem>>, vector<1x128x128xbf16>,
    %c0_8 = arith.constant 0 : index
    %c0_9 = arith.constant 0 : index
    %c0_10 = arith.constant 0 : index
    %11 = vector.load %arg5[%c0_8, %c0_9, %c0_10] : memref<1x1x128xf32, #tpu.memory_space<vmem>>, vector<1x1x128xf32>
    %12 = vector.shape_cast %11 : vector<1x1x128xf32> to vector<1x128xf32>
    %cst_11 = arith.constant dense<0.000000e+00> : vector<128xf32>
    %13 = vector.multi_reduction <add>, %6, %cst_11 [0] : vector<128x128xf32> to vector<128xf32>
    %14 = vector.shape_cast %13 : vector<128xf32> to vector<1x128xf32>
    %15 = arith.addf %12, %14 : vector<1x128xf32>
    %c0_12 = arith.constant 0 : index
    %c0_13 = arith.constant 0 : index
    %c0_14 = arith.constant 0 : index
    %16 = vector.load %arg5[%c0_12, %c0_13, %c0_14] : memref<1x1x128xf32, #tpu.memory_space<vmem>>, vector<1x1x128xf32>
    %17 = vector.shape_cast %16 : vector<1x1x128xf32> to vector<1x128xf32>
    %18 = vector.shape_cast %15 : vector<1x128xf32> to vector<1x1x128xf32>
    tpu.vector_store %arg5[%c0_12, %c0_13, %c0_14], %18 {strides = array<i32>} : memref<1x1x128xf32, #tpu.memory_space<vmem>>, vector<1x1x128xf32>,
    %c0_15 = arith.constant 0 : index
    %c0_16 = arith.constant 0 : index
    %c0_17 = arith.constant 0 : index
    %19 = vector.load %arg6[%c0_15, %c0_16, %c0_17] : memref<1x1x128xf32, #tpu.memory_space<vmem>>, vector<1x1x128xf32>
    %20 = vector.shape_cast %19 : vector<1x1x128xf32> to vector<1x128xf32>
    %21 = arith.mulf %6, %6 : vector<128x128xf32>
    %cst_18 = arith.constant dense<0.000000e+00> : vector<128xf32>
    %22 = vector.multi_reduction <add>, %21, %cst_18 [0] : vector<128x128xf32> to vector<128xf32>
    %23 = vector.shape_cast %22 : vector<128xf32> to vector<1x128xf32>
    %24 = arith.addf %20, %23 : vector<1x128xf32>
    %c0_19 = arith.constant 0 : index
    %c0_20 = arith.constant 0 : index
    %c0_21 = arith.constant 0 : index
    %25 = vector.load %arg6[%c0_19, %c0_20, %c0_21] : memref<1x1x128xf32, #tpu.memory_space<vmem>>, vector<1x1x128xf32>
    %26 = vector.shape_cast %25 : vector<1x1x128xf32> to vector<1x128xf32>
    %27 = vector.shape_cast %24 : vector<1x128xf32> to vector<1x1x128xf32>
    tpu.vector_store %arg6[%c0_19, %c0_20, %c0_21], %27 {strides = array<i32>} : memref<1x1x128xf32, #tpu.memory_space<vmem>>, vector<1x1x128xf32>,
    return
  }
  func.func @transform_0(%arg0: i32, %arg1: i32) -> (i32, i32, i32) {
    %c0_i32 = arith.constant 0 : i32
    %c0_i32_0 = arith.constant 0 : i32
    return %arg0, %arg1, %c0_i32 : i32, i32, i32
  }
  func.func @transform_1(%arg0: i32, %arg1: i32) -> (i32, i32) {
    %c0_i32 = arith.constant 0 : i32
    %c0_i32_0 = arith.constant 0 : i32
    %c0_i32_1 = arith.constant 0 : i32
    return %c0_i32, %c0_i32_0 : i32, i32
  }
  func.func @transform_2(%arg0: i32, %arg1: i32) -> (i32, i32, i32) {
    %c0_i32 = arith.constant 0 : i32
    %c0_i32_0 = arith.constant 0 : i32
    return %arg0, %arg1, %c0_i32 : i32, i32, i32
  }
  func.func @transform_3(%arg0: i32, %arg1: i32) -> (i32, i32, i32) {
    %c0_i32 = arith.constant 0 : i32
    %c0_i32_0 = arith.constant 0 : i32
    %c0_i32_1 = arith.constant 0 : i32
    return %arg0, %c0_i32, %c0_i32_0 : i32, i32, i32
  }
  func.func @transform_4(%arg0: i32, %arg1: i32) -> (i32, i32, i32) {
    %c0_i32 = arith.constant 0 : i32
    %c0_i32_0 = arith.constant 0 : i32
    %c0_i32_1 = arith.constant 0 : i32
    return %arg0, %c0_i32, %c0_i32_0 : i32, i32, i32
  }
}

</mosaic_0001>

<bundles_post_ra>
// kernel: tpu_custom_call.1
= control target key start
LH: loop header
LB: loop body
LE: loop exit
PB: predicated region body
PF: predicated region fallthrough
CT: control target
= control target key end

     0   :  { %10 = vsyncpa [#allocation3], 0  ;;  %s1628_s0 = inlined_call_operand.vmem [shape: bf16[2,256,48], index: 0, kind: input, shape index: {}]   ;;  %s1629_s1 = inlined_call_operand.vmem [shape: bf16[48,128], index: 1, kind: input, shape index: {}]   ;;  %s1630_s2 = inlined_call_operand.hbm [shape: bf16[2,256,128], index: 2, kind: output, shape index: {0}]   ;;  %s1631_s3 = inlined_call_operand.hbm [shape: f32[2,1,128], index: 3, kind: output, shape index: {1}]   ;;  %s1632_s4 = inlined_call_operand.hbm [shape: f32[2,1,128], index: 4, kind: output, shape index: {2}]  }
   0x1   :  { %12 = vsyncpa [#allocation3 + $0x1], 0 }
   0x2   :  { %13 = vsyncpa [#allocation5], 0 }
   0x3   :  { %15 = vsyncpa [#allocation5 + $0x1], 0  ;;  %s1260_s15 = smov 0   ;;  %s1262_s16 = smov 0  }
   0x4   :  { %s1264_s17 = smov 0   ;;  %s1266_s18 = smov 0  }
   0x5   :  { %s1268_s19 = smov 0   ;;  %s1270_s20 = smov 0  }
   0x6   :  { %s1272_s21 = smov 0   ;;  %s1274_s22 = smov 0  }
   0x7   :  { %s1276_s23 = smov 0   ;;  %s1278_s24 = smov 0  }
   0x8   :  { %s1280_s25 = smov 0  }
   0x9 LB: > { %1641 = sst [smem:[#allocation9_spill]] %s1207_s20  ;;  %s1634_s26 = sadd.s32 4294967295, %s1227_s25   ;;  %s1227_s25 = sphi %s1280_s25, %s21_s25   ;;  %s1223_s24 = sphi %s1278_s24, %s1661_s24   ;;  %s1219_s23 = sphi %s1276_s23, %s1660_s23   ;;  %s1215_s22 = sphi %s1274_s22, %s1659_s22   ;;  %s1211_s21 = sphi %s1272_s21, %s1658_s21   ;;  %s1207_s20 = sphi %s1270_s20, %s1657_s20   ;;  %s1203_s19 = sphi %s1268_s19, %s1666_s19   ;;  %s1199_s18 = sphi %s1266_s18, %s1665_s18   ;;  %s1195_s17 = sphi %s1264_s17, %s1664_s17   ;;  %s1191_s16 = sphi %s1262_s16, %s1663_s16   ;;  %s1187_s15 = sphi %s1260_s15, %s1662_s15  }
   0xa   : > { %1642 = sst [smem:[#allocation10_spill]] %s1219_s23  ;;  %s1633_s27 = sadd.s32 4294967294, %s1227_s25  }
   0xb   : > { %1643 = sst [smem:[#allocation11_spill]] %s1223_s24  ;;  %s30_s28 = sadd.s32 1, %s1219_s23 }
   0xc   : > { %s33_s29 = sadd.s32 1, %s1223_s24  ;;  %p31_p0 = scmp.ge.s32.totalorder %s30_s28, 2 }
   0xd   : > { %s91_s30 = sadd.s32 1, %s1207_s20  ;;  %p101_p1 = scmp.ne.s32.totalorder %s1207_s20, %s1203_s19 }
   0xe   : > { %p1324_p2 = scmp.eq.s32.totalorder %s1634_s26, 3  ;;  %s1668_s28 = smov (%p31_p0, %s30_s28), 0 }
   0xf   : > { %1645 = sst [smem:[#allocation12_spill]] %s1668_s28  ;;  %s1670_s29 = smov (!%p31_p0, %s33_s29), %s1223_s24 }
  0x10   : > { %s87_s6 = ssub.s32 %s1219_s23, %s1668_s28  ;;  %p1335_p3 = por %p1324_p2, %p101_p1 }
  0x11   : > { %p35_p4 = scmp.ge.s32.totalorder %s1670_s29, 2  ;;  %p107_p5 = scmp.ne.s32.totalorder %s1203_s19, %s1199_s18 }
  0x12   : > { %p1343_p6 = scmp.eq.s32.totalorder %s1633_s27, 3  ;;  %s117_s9 = sadd.s32 1, %s1195_s17 }
  0x13   : > { %s1672_s29 = smov (%p35_p4, %s1670_s29), 0  ;;  %p127_p8 = scmp.ne.s32.totalorder %s1195_s17, %s1191_s16 }
  0x14   : > { %1648 = sst [smem:[#allocation13_spill]] %s1672_s29  ;;  %p1352_p7 = por %p1343_p6, %p107_p5 }
  0x15   : > { %s86_s11 = ssub.s32 %s1223_s24, %s1672_s29  ;;  %p133_p9 = scmp.ne.s32.totalorder %s1191_s16, %s1187_s15 }
  0x16   : > { %s88_s12 = sor.u32 %s87_s6, %s86_s11  ;;  %p115_p10 = scmp.eq.s32.totalorder %s86_s11, 0 }
  0x17   : > { %p89_p11 = scmp.eq.s32.totalorder %s88_s12, 0  ;;  %p1364_p12 = por %p127_p8, %p1324_p2 }
  0x18   : > { %s1369_s14 = scalar_select %p115_p10, %s1195_s17, %s117_s9  }
  0x19   : > { %s1372_s27 = scalar_select %p89_p11, %s1207_s20, %s91_s30  }
  0x1a   : > { %p1376_p13 = por %p133_p9, %p1343_p6  ;;  %p785_p0 = scmp.ge.s32.totalorder %s1227_s25, 1 }
  0x1b   : > { %1651 = sst [smem:[#allocation14_spill]] %s1372_s27  ;;  %p194_p1 = scmp.lt.s32.totalorder %s1227_s25, 5 }
  0x1d   : > { %p195_p4 = pnand %p785_p0, %p194_p1 }
  0x1e   : > { %s1640_s15 = sand.u32 (!%p195_p4), 1, %s1203_s19   ;;  %s224_s5 = sand.u32 (!%p195_p4), 1, %s1191_s16  }
  0x1f   : > { %198 = sbr.rel (%p195_p4) target bundleno = 345 (0x159), region = 28  ;;  %s786_s30 = sshll.u32 (!%p195_p4), %s1640_s15, 6 }
  0x20   : > { %s1387_s6 = sshll.u32 (!%p195_p4), %s1211_s21, 4  ;;  %p233_p2 = scmp.lt.s32.totalorder (!%p195_p4), %s1215_s22, 1 }
  0x21   : > { %p235_p5 = scmp.lt.s32.totalorder (!%p195_p4), %s1387_s6, 31  ;;  %s1398_s27 = scalar_lea.vmem (!%p195_p4), [#allocation2], %s786_s30 }
  0x22   : > { %s1400_s20 = scalar_lea.vmem (!%p195_p4), [#allocation4], %s224_s5  ;;  %s1402_s15 = scalar_lea.vmem (!%p195_p4), [#allocation6], %s224_s5 }
  0x23   : > { %p790_p6 = scmp.ne.s32.totalorder (!%p195_p4), %s1211_s21, 0 }
  0x24   : > { %s234_s8 = scalar_select %p233_p2, %s1215_s22, 1 }
  0x25   : > { %s236_s9 = scalar_select %p235_p5, %s1387_s6, 31 }
  0x26   : > { %s788_s11 = sshll.u32 %s234_s8, 5  ;;  %247 = sbr.rel (%p790_p6) target bundleno = 45 (0x2d), region = 32 }
  0x27   : > { %s238_s12 = sadd.s32 %s788_s11, %s236_s9 }
  0x28   : > { %s789_s29 = sshll.u32 %s238_s12, 2 }
  0x29   : > { %s1396_s23 = scalar_lea.vmem %s1628_s0, %s789_s29 }
  0x2b   : > { %v1229_v0 = vmov 0.0  }
  0x2c   : > { %248 = vst [vmem:[%s1400_s20] sm:$0x1] %v1229_v0  ;;  %249 = vst [vmem:[%s1402_s15] sm:$0x1] %v1229_v0 }
  0x2d PF: > { %v1044_v1 = vld [vmem:[%s1629_s1 + $0x10] sm:$0xff]   ;;  %v1045_v2 = vld [vmem:[%s1629_s1 + $0x8] sm:$0xff]   ;;  %vm330_vm0 = vcmask 392192   ;;  %v1047_v3 = vld [vmem:[%s1396_s23] sm:$0xff]   ;;  %s620_s11 = sshll.u32 %s1398_s27, 4  ;;  %s1653_s9 = sand.u32 1, %s1203_s19   ;;  %s1465_s11 = int_to_ptr.vmem [resolvable:$true] %s620_s11 }
  0x2e   : > { %908 = vmatprep.subr.bf16.mxu0 %v1044_v1  ;;  %930 = vmatprep.subr.bf16.mxu1 %v1044_v1  ;;  %v1046_v4 = vld [vmem:[%s1629_s1] sm:$0xff]   ;;  %v1048_v6 = vld [vmem:[%s1396_s23 + $0x8] sm:$0xff]   ;;  %v1049_v8 = vld [vmem:[%s1396_s23 + $0x10] sm:$0xff]   ;;  %s1473_s24 = scalar_lea.sflag [#allocation3], %s1653_s9  ;;  %s1055_s28 = scalar_lea.vmem %s1465_s11, 1024 }
  0x2f   : > { %909 = vmatpush3.bf16.msra.mxu0 %v1044_v1  ;;  %933 = vmatpush3.bf16.msra.mxu1 %v1044_v1  ;;  %v1051_v5 = vld [vmem:[%s1396_s23 + $0x20] sm:$0xff]   ;;  %v1052_v7 = vld [vmem:[%s1396_s23 + $0x28] sm:$0xff]   ;;  %v1053_v9 = vld [vmem:[%s1396_s23 + $0x30] sm:$0xff]   ;;  %p1056_p8 = scmp.ne.s32.totalorder %s1465_s11, %s1055_s28  ;;  %s1230_s21 = smov [#allocation2]  }
  0x30   : > { %910 = vmatprep.subr.bf16.mxu0 %v1045_v2  ;;  %931 = vmatprep.subr.bf16.mxu1 %v1045_v2  ;;  %v1050_v10 = vld [vmem:[%s1396_s23 + $0x18] sm:$0xff]   ;;  %s1059_s29 = sshll.u32 %s1230_s21, 4  ;;  %s1060_s29 = int_to_ptr.vmem [resolvable:$false] %s1059_s29 }
  0x31   : > { %914 = vmatprep.mubr.msk.bf16.mxu0 %vm330_vm0, %v1047_v3  ;;  %922 = vmatprep.mubr.msk.bf16.mxu1 %vm330_vm0, %v1051_v5  ;;  %v1054_v11 = vld [vmem:[%s1396_s23 + $0x38] sm:$0xff]   ;;  %s828_s23 = sshll.u32 %s1215_s22, 5  ;;  %p1057_p9 = pnand %p1056_p8, %p1335_p3 }
  0x32   : > { %s617_s5 = sadd.s32 %s828_s23, %s1387_s6  ;;  %s1061_s23 = scalar_lea.vmem %s1060_s29, 2048 }
  0x33   : > { %911 = vmatpush3.bf16.msra.mxu0 %v1045_v2  ;;  %934 = vmatpush3.bf16.msra.mxu1 %v1045_v2  ;;  %s829_s30 = sshll.u32 %s617_s5, 6  ;;  %p1058_p10 = pneg %p1057_p9 }
  0x34   : > { %912 = vmatprep.subr.bf16.mxu0 %v1046_v4  ;;  %932 = vmatprep.subr.bf16.mxu1 %v1046_v4  ;;  %s1463_s8 = scalar_lea.hbm %s1630_s2, %s829_s30  ;;  %p1062_p11 = scmp.lt.s32.totalorder %s1465_s11, %s1060_s29 }
  0x35   : > { %p1063_p0 = scmp.lt.s32.totalorder %s1061_s23, %s1055_s28 }
  0x37   : > { %913 = vmatpush3.bf16.msra.mxu0 %v1046_v4  ;;  %935 = vmatpush3.bf16.msra.mxu1 %v1046_v4  ;;  %p1064_p1 = por %p1063_p0, %p1062_p11 }
  0x39   : > { %p1065_p4 = pnand %p1064_p1, %p1058_p10 }
  0x3a   : > { %915 = vmatmul.mubr.msk.bf16.vlgmr.msra.gmra.mxu0 %vm330_vm0, %v1048_v6  ;;  %923 = vmatmul.mubr.msk.bf16.vlgmr.msra.gmra.mxu1 %vm330_vm0, %v1052_v7 }
  0x3b   : > { %918 = vmatprep.mubr.msk.bf16.mxu0 %vm330_vm0, %v1049_v8  ;;  %926 = vmatprep.mubr.msk.bf16.mxu1 %vm330_vm0, %v1053_v9 }
  0x42   : > { %919 = vmatmul.mubr.msk.bf16.gmra.mxu0 %vm330_vm0, %v1050_v10  ;;  %927 = vmatmul.mubr.msk.bf16.gmra.mxu1 %vm330_vm0, %v1054_v11 }
  0xfa   : > { %v916_v12 = vpop.f32.mrf.mxu0  ;;  %v1432_v13 = vpop.f32.mrf.mxu1 }
  0xfb   : > { %v559_v29 = vmul.f32 %v916_v12, %v916_v12 }
  0xfc   : > { %v389_v14 = vpop.f32.mrf.mxu0  ;;  %v1434_v15 = vpop.f32.mrf.mxu1 }
  0xfd   : > { %v557_v20 = vmul.f32 %v389_v14, %v389_v14 }
  0xfe   : > { %v917_v16 = vpop.f32.mrf.mxu0  ;;  %v1436_v17 = vpop.f32.mrf.mxu1 }
  0xff   : > { %v858_v18 = vpack.c.bf16 %v917_v16, %v916_v12  ;;  %v878_v19 = vpack.c.bf16 %v1436_v17, %v1432_v13  ;;  %v560_v34 = vmul.f32 %v917_v16, %v917_v16 }
 0x100   : > { %v392_v21 = vpop.f32.mrf.mxu0  ;;  %v1440_v22 = vpop.f32.mrf.mxu1 }
 0x101   : > { %890 = vst [vmem:[%s1398_s27 + $0x8] sm:$0xff] %v858_v18   ;;  %v853_v23 = vpack.c.bf16 %v392_v21, %v389_v14  ;;  %v533_v24 = vadd.f32 %v392_v21, %v389_v14  ;;  %v558_v25 = vmul.f32 %v392_v21, %v392_v21  ;;  %894 = vst [vmem:[%s1398_s27 + $0x28] sm:$0xff] %v878_v19  }
 0x102   : > { %v873_v26 = vpack.c.bf16 %v1440_v22, %v1434_v15  ;;  %v920_v27 = vpop.f32.mrf.mxu0  ;;  %v1447_v28 = vpop.f32.mrf.mxu1 }
 0x103   : > { %854 = vst [vmem:[%s1398_s27] sm:$0xff] %v853_v23   ;;  %v534_v30 = vadd.f32 %v916_v12, %v533_v24  ;;  %v573_v31 = vadd.f32 %v558_v25, %v557_v20  ;;  %v563_v51 = vmul.f32 %v920_v27, %v920_v27 }
 0x104   : > { %893 = vst [vmem:[%s1398_s27 + $0x20] sm:$0xff] %v873_v26   ;;  %v405_v32 = vpop.f32.mrf.mxu0  ;;  %v1452_v33 = vpop.f32.mrf.mxu1 }
 0x105   : > { %v574_v35 = vadd.f32 %v573_v31, %v559_v29  ;;  %v535_v36 = vadd.f32 %v917_v16, %v534_v30  ;;  %v561_v40 = vmul.f32 %v405_v32, %v405_v32 }
 0x106   : > { %v921_v37 = vpop.f32.mrf.mxu0  ;;  %v1454_v38 = vpop.f32.mrf.mxu1 }
 0x107   : > { %v536_v39 = vadd.f32 %v535_v36, %v405_v32  ;;  %v575_v41 = vadd.f32 %v574_v35, %v560_v34  ;;  %v868_v42 = vpack.c.bf16 %v921_v37, %v920_v27  ;;  %v888_v44 = vpack.c.bf16 %v1454_v38, %v1447_v28 }
 0x108   : > { %v408_v43 = vpop.f32.mrf.mxu0  ;;  %v440_v45 = vpop.f32.mrf.mxu1  ;;  %v564_v54 = vmul.f32 %v921_v37, %v921_v37 }
 0x109   : > { %v576_v46 = vadd.f32 %v575_v41, %v561_v40  ;;  %892 = vst [vmem:[%s1398_s27 + $0x18] sm:$0xff] %v868_v42   ;;  %v863_v47 = vpack.c.bf16 %v408_v43, %v405_v32  ;;  %v537_v48 = vadd.f32 %v536_v39, %v408_v43  ;;  %v562_v49 = vmul.f32 %v408_v43, %v408_v43 }
 0x10a   : > { %896 = vst [vmem:[%s1398_s27 + $0x38] sm:$0xff] %v888_v44   ;;  %v883_v50 = vpack.c.bf16 %v440_v45, %v1452_v33 }
 0x10b   : > { %891 = vst [vmem:[%s1398_s27 + $0x10] sm:$0xff] %v863_v47   ;;  %v538_v52 = vadd.f32 %v920_v27, %v537_v48  ;;  %v577_v53 = vadd.f32 %v576_v46, %v562_v49 }
 0x10c   : > { %895 = vst [vmem:[%s1398_s27 + $0x30] sm:$0xff] %v883_v50  }
 0x10d   : > { %v539_v55 = vadd.f32 %v921_v37, %v538_v52  ;;  %v578_v56 = vadd.f32 %v577_v53, %v563_v51 }
 0x10e   : > { %1068 = shalt.err (!%p1065_p4)
}
 0x10f   : > { %s1069_s27 = scalar_lea.hbm %s1463_s8, 1024  ;;  %s1073_s6 = scalar_lea.hbm %s1630_s2, 4096 }
 0x110   : > { %p1070_p2 = scmp.ne.s32.totalorder %s1463_s8, %s1069_s27  ;;  %p1074_p8 = scmp.lt.s32.totalorder %s1463_s8, %s1630_s2 }
 0x111   : > { %p1075_p9 = scmp.lt.s32.totalorder %s1073_s6, %s1069_s27 }
 0x112   : > { %p1071_p5 = pnand %p1070_p2, %p1335_p3 }
 0x113   : > { %p1076_p10 = por %p1075_p9, %p1074_p8 }
 0x114   : > { %p1072_p6 = pneg %p1071_p5 }
 0x116   : > { %p1077_p11 = pnand %p1076_p10, %p1072_p6 }
 0x118   : > { %1080 = shalt.err (!%p1077_p11)
}
 0x119   : > { %s1231_s28 = smov 64   ;;  %s1232_s21 = smov 4   ;;  %v565_v57 = vmul.f32 %v1434_v15, %v1434_v15  ;;  %v579_v58 = vadd.f32 %v578_v56, %v564_v54  ;;  %v540_v59 = vadd.f32 %v539_v55, %v1434_v15  ;;  %v566_v61 = vmul.f32 %v1440_v22, %v1440_v22  ;;  %v532_v27 = vld [vmem:[%s1400_s20] sm:$0x1] }
 0x11a   : > { %936 = dma.vmem_to_hbm [thread:$0]  (%p1335_p3), %s1465_s11, 1024, %s1463_s8, %s1473_s24, %s1231_s28, %s1231_s28, %s1232_s21   ;;  %v567_v63 = vmul.f32 %v1432_v13, %v1432_v13  ;;  %v568_v2 = vmul.f32 %v1436_v17, %v1436_v17  ;;  %v569_v6 = vmul.f32 %v1452_v33, %v1452_v33  ;;  %v570_v10 = vmul.f32 %v440_v45, %v440_v45 }
 0x11b   : > { %v541_v60 = vadd.f32 %v540_v59, %v1440_v22  ;;  %v580_v62 = vadd.f32 %v579_v58, %v565_v57  ;;  %v571_v11 = vmul.f32 %v1447_v28, %v1447_v28  ;;  %v572_v14 = vmul.f32 %v1454_v38, %v1454_v38  ;;  %s1654_s7 = sadd.s32 4294967295, %s1227_s25   ;;  %s830_s8 = sshll.u32 %s1215_s22, 4  ;;  %v556_v30 = vld [vmem:[%s1402_s15] sm:$0x1] }
 0x11c   : > { %s1519_s11 = sand.u32 1, %s1654_s7   ;;  %s636_s24 = sshll.u32 %s1400_s20, 4  ;;  %s1531_s24 = int_to_ptr.vmem [resolvable:$true] %s636_s24 }
 0x11d   : > { %v542_v0 = vadd.f32 %v1432_v13, %v541_v60  ;;  %v581_v1 = vadd.f32 %v580_v62, %v566_v61  ;;  %s649_s29 = sshll.u32 %s1402_s15, 4  ;;  %s1529_s5 = scalar_lea.hbm %s1631_s3, %s830_s8  ;;  %s1539_s29 = int_to_ptr.vmem [resolvable:$true] %s649_s29 }
 0x11e   : > { %s1537_s6 = scalar_lea.hbm %s1632_s4, %s830_s8  ;;  %s602_s12 = scalar_lea.sflag [#allocation5], %s1519_s11 }
 0x11f   : > { %v582_v3 = vadd.f32 %v581_v1, %v567_v63  ;;  %v543_v4 = vadd.f32 %v1436_v17, %v542_v0  ;;  %s1081_s9 = scalar_lea.vmem %s1531_s24, 16  ;;  %s1233_s28 = smov [#allocation4]  }
 0x120   : > { %p1082_p3 = scmp.ne.s32.totalorder %s1531_s24, %s1081_s9  ;;  %s1085_s21 = sshll.u32 %s1233_s28, 4  ;;  %s1086_s21 = int_to_ptr.vmem [resolvable:$false] %s1085_s21 }
 0x121   : > { %v544_v5 = vadd.f32 %v543_v4, %v1452_v33  ;;  %v583_v7 = vadd.f32 %v582_v3, %v568_v2  ;;  %s1087_s7 = scalar_lea.vmem %s1086_s21, 32  ;;  %p1088_p4 = scmp.lt.s32.totalorder %s1531_s24, %s1086_s21 }
 0x122   : > { %p1083_p0 = pnand %p1082_p3, %p1364_p12  ;;  %p1089_p2 = scmp.lt.s32.totalorder %s1087_s7, %s1081_s9 }
 0x123   : > { %v584_v8 = vadd.f32 %v583_v7, %v569_v6  ;;  %v545_v9 = vadd.f32 %v544_v5, %v440_v45 }
 0x124   : > { %p1084_p1 = pneg %p1083_p0  ;;  %p1090_p5 = por %p1089_p2, %p1088_p4 }
 0x125   : > { %v546_v12 = vadd.f32 %v1447_v28, %v545_v9  ;;  %v585_v13 = vadd.f32 %v584_v8, %v570_v10 }
 0x126   : > { %p1091_p6 = pnand %p1090_p5, %p1084_p1 }
 0x127   : > { %v547_v15 = vadd.f32 %v1454_v38, %v546_v12  ;;  %v586_v16 = vadd.f32 %v585_v13, %v571_v11 }
 0x129   : > { %v548_v17 = vrot.slane %v547_v15, 4  ;;  %v587_v18 = vadd.f32 %v586_v16, %v572_v14 }
 0x12b   : > { %v549_v19 = vadd.f32 %v548_v17, %v547_v15  ;;  %v588_v20 = vrot.slane %v587_v18, 4 }
 0x12d   : > { %v550_v21 = vrot.slane %v549_v19, 2  ;;  %v589_v22 = vadd.f32 %v588_v20, %v587_v18 }
 0x12f   : > { %v590_v23 = vrot.slane %v589_v22, 2  ;;  %v551_v24 = vadd.f32 %v550_v21, %v549_v19 }
 0x131   : > { %v552_v25 = vrot.slane %v551_v24, 1  ;;  %v591_v26 = vadd.f32 %v590_v23, %v589_v22 }
 0x133   : > { %v553_v28 = vadd.f32 %v552_v25, %v551_v24  ;;  %v592_v29 = vrot.slane %v591_v26, 1 }
 0x135   : > { %v554_v31 = vadd.f32 %v553_v28, %v532_v27  ;;  %v593_v32 = vadd.f32 %v592_v29, %v591_v26 }
 0x137   : > { %555 = vst [vmem:[%s1400_s20] sm:$0x1] %v554_v31  ;;  %v594_v33 = vadd.f32 %v593_v32, %v556_v30 }
 0x138   : > { %1094 = shalt.err (!%p1091_p6)
}
 0x139   : > { %s1095_s20 = scalar_lea.hbm %s1529_s5, 16  ;;  %s1099_s27 = scalar_lea.hbm %s1631_s3, 32 }
 0x13a   : > { %p1096_p8 = scmp.ne.s32.totalorder %s1529_s5, %s1095_s20  ;;  %p1100_p11 = scmp.lt.s32.totalorder %s1529_s5, %s1631_s3 }
 0x13b   : > { %p1101_p3 = scmp.lt.s32.totalorder %s1099_s27, %s1095_s20 }
 0x13c   : > { %p1097_p9 = pnand %p1096_p8, %p1364_p12 }
 0x13d   : > { %p1102_p0 = por %p1101_p3, %p1100_p11 }
 0x13e   : > { %p1098_p10 = pneg %p1097_p9 }
 0x140   : > { %p1103_p1 = pnand %p1102_p0, %p1098_p10 }
 0x142   : > { %1106 = shalt.err (!%p1103_p1)
}
 0x143   : > { %937 = dma.vmem_to_hbm [thread:$0]  (%p1364_p12), %s1531_s24, 16, %s1529_s5, %s602_s12   ;;  %595 = vst [vmem:[%s1402_s15] sm:$0x1] %v594_v33 }
 0x144   : > { %s1107_s9 = scalar_lea.vmem %s1539_s29, 16  ;;  %s1234_s28 = smov [#allocation6]  }
 0x145   : > { %p1108_p4 = scmp.ne.s32.totalorder %s1539_s29, %s1107_s9  ;;  %s1111_s21 = sshll.u32 %s1234_s28, 4  ;;  %s1112_s21 = int_to_ptr.vmem [resolvable:$false] %s1111_s21 }
 0x146   : > { %s1113_s7 = scalar_lea.vmem %s1112_s21, 32  ;;  %p1114_p6 = scmp.lt.s32.totalorder %s1539_s29, %s1112_s21 }
 0x147   : > { %p1109_p2 = pnand %p1108_p4, %p1364_p12  ;;  %p1115_p8 = scmp.lt.s32.totalorder %s1113_s7, %s1107_s9 }
 0x149   : > { %p1110_p5 = pneg %p1109_p2  ;;  %p1116_p9 = por %p1115_p8, %p1114_p6 }
 0x14b   : > { %p1117_p10 = pnand %p1116_p9, %p1110_p5 }
 0x14d   : > { %1120 = shalt.err (!%p1117_p10)
}
 0x14e   : > { %s1121_s24 = scalar_lea.hbm %s1537_s6, 16  ;;  %s1125_s20 = scalar_lea.hbm %s1632_s4, 32 }
 0x14f   : > { %p1122_p11 = scmp.ne.s32.totalorder %s1537_s6, %s1121_s24  ;;  %p1126_p1 = scmp.lt.s32.totalorder %s1537_s6, %s1632_s4 }
 0x150   : > { %p1127_p4 = scmp.lt.s32.totalorder %s1125_s20, %s1121_s24 }
 0x151   : > { %p1123_p3 = pnand %p1122_p11, %p1364_p12 }
 0x152   : > { %p1128_p2 = por %p1127_p4, %p1126_p1 }
 0x153   : > { %p1124_p0 = pneg %p1123_p3 }
 0x155   : > { %p1129_p5 = pnand %p1128_p2, %p1124_p0 }
 0x157   : > { %1132 = shalt.err (!%p1129_p5)
}
 0x158   : > { %938 = dma.vmem_to_hbm [thread:$0]  (%p1364_p12), %s1539_s29, 16, %s1537_s6, %s602_s12  }
 0x159 PF: > { %p952_p6 = scmp.ge.s32.totalorder %s1227_s25, 2  ;;  %s661_s27 = sand.u32 1, %s1199_s18  }
 0x15a   : > { %s662_s22 = scalar_lea.sflag [#allocation3], %s661_s27 }
 0x15b   : > { %p943_p8 = pnand %p952_p6, %p1352_p7 }
 0x15d   : > { %p944_p9 = pneg %p943_p8 }
 0x15f   : > { %1178 = dma.done.wait (%p944_p9), %s662_s22, 1024  }
 0x160   : > { %1180 = vsyncadd (%p944_p9), %s662_s22, 4294966272  ;;  %s1655_s30 = sadd.s32 4294967294, %s1227_s25   ;;  %p946_p10 = pnand %p952_p6, %p1376_p13 }
 0x161   : > { %s670_s13 = sand.u32 1, %s1655_s30  }
 0x162   : > { %p947_p11 = pneg %p946_p10  ;;  %s671_s11 = scalar_lea.sflag [#allocation5], %s670_s13 }
 0x164   : > { %1182 = dma.done.wait (%p947_p11), %s671_s11, 32  }
 0x165   : > { %1184 = vsyncadd (%p947_p11), %s671_s11, 4294967264  ;;  %s21_s25 = sadd.s32 1, %s1227_s25   ;;  %s1656_s10 = sld [smem:[#allocation9_spill]] }
 0x166   : > { %p18_p12 = scmp.ge.s32.totalorder %s21_s25, 6   ;;  %s1657_s20 = sld [smem:[#allocation14_spill]] }
 0x167   : > { %s1658_s21 = sld [smem:[#allocation10_spill]]  ;;  %s1662_s15 = smov %s1191_s16 }
 0x168   : > { %s1659_s22 = sld [smem:[#allocation11_spill]]  ;;  %s1663_s16 = smov %s1195_s17 }
 0x169   : > { %s1660_s23 = sld [smem:[#allocation12_spill]]  ;;  %s1664_s17 = smov %s1369_s14 }
 0x16a   : > { %s1661_s24 = sld [smem:[#allocation13_spill]]  ;;  %s1665_s18 = smov %s1203_s19 }
 0x16b   : > { %s1666_s19 = smov %s1656_s10  ;;  %20 = sbr.rel (!%p18_p12) target bundleno = 9 (0x9), region = 99 }
 0x170   :  { %683 = vsyncpa [#allocation3], 1 }
 0x171   :  { %685 = vsyncpa [#allocation3 + $0x1], 1 }
 0x172   :  { %686 = vsyncpa [#allocation5], 1 }
 0x173   :  { %688 = vsyncpa [#allocation5 + $0x1], 1 }

</bundles_post_ra>
